<compile_context>
chip_gen: v6e
topology: v6e:2x2x1
jax: 0.10.0
libtpu: 0.0.40
codegen_flags: <defaults>
</compile_context>

<pallas_src>
import functools
import math

import jax
import jax.numpy as jnp
from jax.experimental import pallas as pl
from jax.experimental.pallas import tpu as pltpu


def _default_vmem_limit():
    # v5e/v6e: 128 MiB physical VMEM -> 64 MiB scoped is safe.
    # v7x: 64 MiB physical -> leave ~25% headroom for compiler-internal scratch.
    try:
        cap = pltpu.get_tpu_info().vmem_capacity_bytes
        return int(min(64 * 1024 * 1024, cap * 3 // 4))
    except Exception:
        return 48 * 1024 * 1024


_VMEM_LIMIT = _default_vmem_limit()


def _pick_tile(dim, candidates):
    """Largest candidate that evenly divides `dim`, else the full extent."""
    for c in candidates:
        if c <= dim and dim % c == 0:
            return c
    return dim


# ----------------------------------------------------------------------------
# Tiled Linear: y = act(x @ w + b); bf16 MXU matmul, f32 VMEM accumulation,
# bf16 activation output.
# ----------------------------------------------------------------------------
def _linear_kernel(x_ref, w_ref, b_ref, o_ref, acc_ref, *, activation):
    @pl.when(pl.program_id(2) == 0)
    def _():
        acc_ref[...] = jnp.zeros_like(acc_ref)

    acc_ref[...] += jnp.dot(x_ref[...], w_ref[...],
                            preferred_element_type=jnp.float32)

    @pl.when(pl.program_id(2) == pl.num_programs(2) - 1)
    def _():
        y = acc_ref[...] + b_ref[...]
        if activation == "gelu":
            # exact (erf-based) GELU, matching HF BERT "gelu"
            y = 0.5 * y * (1.0 + jax.lax.erf(y * (1.0 / math.sqrt(2.0))))
        elif activation == "tanh":
            y = jnp.tanh(y)
        o_ref[...] = y.astype(o_ref.dtype)


def linear(x, w, b, activation="none", out_dtype=jnp.bfloat16):
    """x:(M,K) @ w:(K,N) + b:(N,), tiled over (M, N, K) with a VMEM accumulator."""
    M, K = x.shape
    _, N = w.shape
    tm = _pick_tile(M, (256, 128, 64, 32, 16, 8))
    tn = _pick_tile(N, (512, 256, 128))
    tk = _pick_tile(K, (512, 256, 128))
    grid = (M // tm, N // tn, K // tk)
    bytes_accessed = int(x.size * x.dtype.itemsize + w.size * w.dtype.itemsize
                         + b.size * 4 + M * N * jnp.dtype(out_dtype).itemsize)
    return pl.pallas_call(
        functools.partial(_linear_kernel, activation=activation),
        out_shape=jax.ShapeDtypeStruct((M, N), out_dtype),
        grid_spec=pltpu.PrefetchScalarGridSpec(
            num_scalar_prefetch=0,
            grid=grid,
            in_specs=[
                pl.BlockSpec((tm, tk), lambda i, j, k: (i, k)),
                pl.BlockSpec((tk, tn), lambda i, j, k: (k, j)),
                pl.BlockSpec((1, tn), lambda i, j, k: (0, j)),
            ],
            out_specs=pl.BlockSpec((tm, tn), lambda i, j, k: (i, j)),
            scratch_shapes=[pltpu.VMEM((tm, tn), jnp.float32)],
        ),
        compiler_params=pltpu.CompilerParams(
            dimension_semantics=("parallel", "parallel", "arbitrary"),
            vmem_limit_bytes=_VMEM_LIMIT,
        ),
        cost_estimate=pl.CostEstimate(
            flops=int(2 * M * N * K),
            transcendentals=int(M * N) if activation in ("gelu", "tanh") else 0,
            bytes_accessed=bytes_accessed),
    )(x, w, b.reshape(1, N))


# ----------------------------------------------------------------------------
# Fused Linear + residual-add + LayerNorm (tn = N = full hidden width):
#   out = LayerNorm(x @ w + b + residual) * gamma + beta
# Residual/LN run in the flush of the last k step — no extra HBM round trip.
# ----------------------------------------------------------------------------
def _linear_res_ln_kernel(x_ref, w_ref, b_ref, r_ref, g_ref, bb_ref, o_ref,
                          acc_ref, *, eps):
    @pl.when(pl.program_id(1) == 0)
    def _():
        acc_ref[...] = jnp.zeros_like(acc_ref)

    acc_ref[...] += jnp.dot(x_ref[...], w_ref[...],
                            preferred_element_type=jnp.float32)

    @pl.when(pl.program_id(1) == pl.num_programs(1) - 1)
    def _():
        y = acc_ref[...] + b_ref[...] + r_ref[...].astype(jnp.float32)
        mean = jnp.mean(y, axis=-1, keepdims=True)
        var = jnp.mean(jnp.square(y - mean), axis=-1, keepdims=True)
        y = (y - mean) * jax.lax.rsqrt(var + eps)
        o_ref[...] = (y * g_ref[...] + bb_ref[...]).astype(o_ref.dtype)


def linear_residual_layernorm(x, w, b, residual, gamma, beta, eps=1e-12,
                              out_dtype=jnp.bfloat16):
    M, K = x.shape
    _, N = w.shape
    tm = _pick_tile(M, (256, 128, 64, 32, 16, 8))
    tk = _pick_tile(K, (512, 256, 128))
    grid = (M // tm, K // tk)
    bytes_accessed = int(x.size * x.dtype.itemsize + w.size * w.dtype.itemsize
                         + residual.size * residual.dtype.itemsize
                         + (b.size + gamma.size + beta.size) * 4
                         + M * N * jnp.dtype(out_dtype).itemsize)
    return pl.pallas_call(
        functools.partial(_linear_res_ln_kernel, eps=eps),
        out_shape=jax.ShapeDtypeStruct((M, N), out_dtype),
        grid_spec=pltpu.PrefetchScalarGridSpec(
            num_scalar_prefetch=0,
            grid=grid,
            in_specs=[
                pl.BlockSpec((tm, tk), lambda i, k: (i, k)),
                pl.BlockSpec((tk, N), lambda i, k: (k, 0)),
                pl.BlockSpec((1, N), lambda i, k: (0, 0)),
                pl.BlockSpec((tm, N), lambda i, k: (i, 0)),   # residual, resident over k
                pl.BlockSpec((1, N), lambda i, k: (0, 0)),
                pl.BlockSpec((1, N), lambda i, k: (0, 0)),
            ],
            out_specs=pl.BlockSpec((tm, N), lambda i, k: (i, 0)),
            scratch_shapes=[pltpu.VMEM((tm, N), jnp.float32)],
        ),
        compiler_params=pltpu.CompilerParams(
            dimension_semantics=("parallel", "arbitrary"),
            vmem_limit_bytes=_VMEM_LIMIT,
        ),
        cost_estimate=pl.CostEstimate(
            flops=int(2 * M * N * K), transcendentals=0,
            bytes_accessed=bytes_accessed),
    )(x, w, b.reshape(1, N), residual, gamma.reshape(1, N), beta.reshape(1, N))


# ----------------------------------------------------------------------------
# Standalone LayerNorm (embeddings only), tiled over rows, bf16 output
# ----------------------------------------------------------------------------
def _layernorm_kernel(x_ref, g_ref, b_ref, o_ref, *, eps):
    x = x_ref[...].astype(jnp.float32)
    mean = jnp.mean(x, axis=-1, keepdims=True)
    var = jnp.mean(jnp.square(x - mean), axis=-1, keepdims=True)
    y = (x - mean) * jax.lax.rsqrt(var + eps)
    o_ref[...] = (y * g_ref[...] + b_ref[...]).astype(o_ref.dtype)


def layernorm(x, gamma, beta, eps=1e-12, out_dtype=jnp.bfloat16):
    M, N = x.shape
    tm = _pick_tile(M, (1024, 512, 256, 128, 64, 32, 16, 8))
    grid = (M // tm,)
    row_spec = pl.BlockSpec((tm, N), lambda i: (i, 0))
    vec_spec = pl.BlockSpec((1, N), lambda i: (0, 0))
    return pl.pallas_call(
        functools.partial(_layernorm_kernel, eps=eps),
        out_shape=jax.ShapeDtypeStruct((M, N), out_dtype),
        grid=grid,
        in_specs=[row_spec, vec_spec, vec_spec],
        out_specs=row_spec,
        compiler_params=pltpu.CompilerParams(
            dimension_semantics=("parallel",),
            vmem_limit_bytes=_VMEM_LIMIT),
    )(x, gamma.reshape(1, N), beta.reshape(1, N))


# ----------------------------------------------------------------------------
# Attention: fused QKV slab, query-tile grid, heads sliced inside the kernel.
#   grid = (B, S // tq); K/V slab stays resident across query tiles.
#   scores via dot_general NT (no explicit k.T); scale folded into q;
#   head outputs stored group-wise in 128-lane-aligned chunks (no big concat).
# ----------------------------------------------------------------------------
def _attention_kernel(q_ref, kv_ref, m_ref, o_ref, *, n_heads, scale):
    H = o_ref.shape[-1]
    Dh = H // n_heads
    mask = m_ref[0]                                          # (1, S) f32 additive

    # Fold softmax scale into q once (f32 multiply, back to bf16 for the MXU).
    q_all = (q_ref[0, :, :H].astype(jnp.float32) * scale).astype(jnp.bfloat16)
    k_all = kv_ref[0, :, H:2 * H]                            # (S, H) bf16
    v_all = kv_ref[0, :, 2 * H:3 * H]                        # (S, H) bf16

    # 128-lane-aligned head groups for the output stores.
    group = 1
    if Dh < 128:
        group = math.gcd(n_heads, max(1, 128 // Dh))

    nt_dims = (((1,), (1,)), ((), ()))                       # contract on Dh (NT)
    for g0 in range(0, n_heads, group):                      # static unroll
        outs = []
        for h in range(g0, g0 + group):
            q = q_all[:, h * Dh:(h + 1) * Dh]
            k = k_all[:, h * Dh:(h + 1) * Dh]
            v = v_all[:, h * Dh:(h + 1) * Dh]
            s = jax.lax.dot_general(q, k, nt_dims,
                                    preferred_element_type=jnp.float32)
            s = s + mask
            s = s - jnp.max(s, axis=-1, keepdims=True)       # f32 max-subtract
            p = jnp.exp(s)
            p = p * pl.reciprocal(jnp.sum(p, axis=-1, keepdims=True), approx=True)
            outs.append(jnp.dot(p.astype(jnp.bfloat16), v,
                                preferred_element_type=jnp.float32))
        blk = outs[0] if group == 1 else jnp.concatenate(outs, axis=-1)
        o_ref[0, :, g0 * Dh:(g0 + group) * Dh] = blk.astype(o_ref.dtype)


def attention(qkv, mask_add, *, n_heads, scale):
    """qkv: (B, S, 3H) fused bf16 projections; mask_add: (B, 1, S) additive f32."""
    B, S, H3 = qkv.shape
    H = H3 // 3
    tq = _pick_tile(S, (256, 128, 64, 32, 16, 8))
    grid = (B, S // tq)
    bytes_accessed = int(qkv.size * qkv.dtype.itemsize + mask_add.size * 4
                         + B * S * H * 2)
    return pl.pallas_call(
        functools.partial(_attention_kernel, n_heads=n_heads, scale=scale),
        out_shape=jax.ShapeDtypeStruct((B, S, H), jnp.bfloat16),
        grid_spec=pltpu.PrefetchScalarGridSpec(
            num_scalar_prefetch=0,
            grid=grid,
            in_specs=[
                pl.BlockSpec((1, tq, H3), lambda b, qi: (b, qi, 0)),  # query rows
                pl.BlockSpec((1, S, H3), lambda b, qi: (b, 0, 0)),    # K/V slab, resident
                pl.BlockSpec((1, 1, S), lambda b, qi: (b, 0, 0)),     # mask (never per-head)
            ],
            out_specs=pl.BlockSpec((1, tq, H), lambda b, qi: (b, qi, 0)),
        ),
        compiler_params=pltpu.CompilerParams(
            dimension_semantics=("parallel", "parallel"),
            vmem_limit_bytes=_VMEM_LIMIT,
        ),
        cost_estimate=pl.CostEstimate(
            flops=int(4 * B * S * S * H),
            transcendentals=int(B * n_heads * S * S),
            bytes_accessed=bytes_accessed),
    )(qkv, qkv, mask_add)


# ----------------------------------------------------------------------------
# Fused pooler + classifier: tanh(cls @ Wp + bp) @ Wc_pad + bc_pad  (lane-padded out)
# ----------------------------------------------------------------------------
def _pool_cls_kernel(x_ref, pw_ref, pb_ref, cw_ref, cb_ref, o_ref):
    pooled = jnp.tanh(
        jnp.dot(x_ref[...], pw_ref[...], preferred_element_type=jnp.float32)
        + pb_ref[...])
    logits = jnp.dot(pooled.astype(jnp.bfloat16), cw_ref[...],
                     preferred_element_type=jnp.float32) + cb_ref[...]
    o_ref[...] = logits.astype(o_ref.dtype)


def pooler_classifier(cls_tok, pool_w, pool_b, cls_w_pad, cls_b_pad):
    B, H = cls_tok.shape
    Np = cls_w_pad.shape[1]
    return pl.pallas_call(
        _pool_cls_kernel,
        out_shape=jax.ShapeDtypeStruct((B, Np), jnp.float32),
        grid=(1,),
        in_specs=[
            pl.BlockSpec((B, H), lambda i: (0, 0)),
            pl.BlockSpec((H, H), lambda i: (0, 0)),
            pl.BlockSpec((1, H), lambda i: (0, 0)),
            pl.BlockSpec((H, Np), lambda i: (0, 0)),
            pl.BlockSpec((1, Np), lambda i: (0, 0)),
        ],
        out_specs=pl.BlockSpec((B, Np), lambda i: (0, 0)),
        compiler_params=pltpu.CompilerParams(vmem_limit_bytes=_VMEM_LIMIT),
    )(cls_tok, pool_w, pool_b.reshape(1, H), cls_w_pad, cls_b_pad.reshape(1, Np))


# ----------------------------------------------------------------------------
# Parameter construction (deterministic, synthetic — no checkpoint loading).
# Matmul weights are stored in bf16 once; biases / LN params stay f32.
# ----------------------------------------------------------------------------
def init_params(key, *, vocab, max_pos, type_vocab, hidden, n_heads, inter,
                n_layers, out_dim):
    keys = iter(jax.random.split(key, 16 + 16 * n_layers))

    def w(shape, scale=0.02):
        return scale * jax.random.normal(next(keys), shape, jnp.float32)

    def wb(shape, scale=0.02):
        return w(shape, scale).astype(jnp.bfloat16)

    out_pad = max(128, ((out_dim + 127) // 128) * 128)
    cls_w = w((hidden, out_dim))
    cls_b = jnp.zeros((out_dim,), jnp.float32)

    p = {
        "word_emb": w((vocab, hidden)),
        "pos_emb": w((max_pos, hidden)),
        "type_emb": w((type_vocab, hidden)),
        "emb_ln_g": jnp.ones((hidden,), jnp.float32),
        "emb_ln_b": jnp.zeros((hidden,), jnp.float32),
        "pool_w": wb((hidden, hidden)),
        "pool_b": jnp.zeros((hidden,), jnp.float32),
        # classifier zero-padded to a 128-lane-dense output width, stored bf16
        "cls_w_pad": jnp.pad(cls_w, ((0, 0), (0, out_pad - out_dim))).astype(jnp.bfloat16),
        "cls_b_pad": jnp.pad(cls_b, (0, out_pad - out_dim)),
        "out_dim": out_dim,
        "layers": [],
    }
    for _ in range(n_layers):
        wq, wk, wv = w((hidden, hidden)), w((hidden, hidden)), w((hidden, hidden))
        p["layers"].append({
            # fused QKV projection: one (H, 3H) bf16 matmul instead of three
            "w_qkv": jnp.concatenate([wq, wk, wv], axis=1).astype(jnp.bfloat16),
            "b_qkv": jnp.zeros((3 * hidden,), jnp.float32),
            "wo": wb((hidden, hidden)), "bo": jnp.zeros((hidden,), jnp.float32),
            "ln1_g": jnp.ones((hidden,), jnp.float32), "ln1_b": jnp.zeros((hidden,), jnp.float32),
            "wi": wb((hidden, inter)), "bi": jnp.zeros((inter,), jnp.float32),
            "wo2": wb((inter, hidden)), "bo2": jnp.zeros((hidden,), jnp.float32),
            "ln2_g": jnp.ones((hidden,), jnp.float32), "ln2_b": jnp.zeros((hidden,), jnp.float32),
        })
    return p


# ----------------------------------------------------------------------------
# Forward pass (mirrors BERTNLIModel.forward)
# ----------------------------------------------------------------------------
def bert_nli_forward(params, sequence, attn_mask, token_type, *, n_heads):
    B, S = sequence.shape
    H = params["word_emb"].shape[1]
    Dh = H // n_heads

    # Embeddings (gathers are XLA glue; sum + LayerNorm == BertEmbeddings)
    pos_ids = jnp.arange(S)
    emb = (jnp.take(params["word_emb"], sequence, axis=0)
           + jnp.take(params["pos_emb"], pos_ids, axis=0)[None, :, :]
           + jnp.take(params["type_emb"], token_type, axis=0))
    x = layernorm(emb.reshape(B * S, H), params["emb_ln_g"], params["emb_ln_b"])

    # Additive attention mask, (B, 1, S) f32; broadcast over heads inside the kernel.
    mask_add = (1.0 - attn_mask.astype(jnp.float32))[:, None, :] * -10000.0

    scale = 1.0 / math.sqrt(Dh)
    for lp in params["layers"]:
        qkv = linear(x, lp["w_qkv"], lp["b_qkv"])                          # (B*S, 3H) bf16
        ctx = attention(qkv.reshape(B, S, 3 * H), mask_add,
                        n_heads=n_heads, scale=scale)                      # (B, S, H) bf16
        # attention output projection + residual + LayerNorm fused in one kernel
        x = linear_residual_layernorm(ctx.reshape(B * S, H), lp["wo"], lp["bo"],
                                      residual=x, gamma=lp["ln1_g"], beta=lp["ln1_b"])
        ffn = linear(x, lp["wi"], lp["bi"], activation="gelu")             # (B*S, I) bf16
        # FFN output projection + residual + LayerNorm fused in one kernel
        x = linear_residual_layernorm(ffn, lp["wo2"], lp["bo2"],
                                      residual=x, gamma=lp["ln2_g"], beta=lp["ln2_b"])

    # BertPooler (tanh(W @ hidden[:, 0])) + self.out classifier, fused in one kernel.
    cls = x.reshape(B, S, H)[:, 0, :]
    logits_pad = pooler_classifier(cls, params["pool_w"], params["pool_b"],
                                   params["cls_w_pad"], params["cls_b_pad"])
    return logits_pad[:, :params["out_dim"]]


# ----------------------------------------------------------------------------
if __name__ == "__main__":
    B, S = 2, 8
    HIDDEN, N_HEADS, INTER, N_LAYERS = 32, 2, 64, 2
    VOCAB, MAX_POS, TYPE_VOCAB, OUT_DIM = 100, 16, 2, 3

    key = jax.random.PRNGKey(0)
    k_params, k_seq = jax.random.split(key)

    params = init_params(k_params, vocab=VOCAB, max_pos=MAX_POS, type_vocab=TYPE_VOCAB,
                         hidden=HIDDEN, n_heads=N_HEADS, inter=INTER,
                         n_layers=N_LAYERS, out_dim=OUT_DIM)

    sequence = jax.random.randint(k_seq, (B, S), 0, VOCAB, dtype=jnp.int32)
    attn_mask = jnp.array([[1, 1, 1, 1, 1, 1, 1, 1],
                           [1, 1, 1, 1, 1, 1, 0, 0]], dtype=jnp.int32)
    token_type = jnp.array([[0, 0, 0, 0, 1, 1, 1, 1],
                            [0, 0, 0, 1, 1, 1, 1, 1]], dtype=jnp.int32)

    logits = bert_nli_forward(params, sequence, attn_mask, token_type, n_heads=N_HEADS)
    jax.block_until_ready(logits)
    assert logits.shape == (B, OUT_DIM)
    print("KERNEL_OK")
</pallas_src>

<mosaic_0001>
module attributes {stable_mosaic.version = 11 : i64} {
  func.func @_layernorm_kernel(%arg0: i32, %arg1: memref<16x32xf32, #tpu.memory_space<vmem>>, %arg2: memref<1x32xf32, #tpu.memory_space<vmem>>, %arg3: memref<1x32xf32, #tpu.memory_space<vmem>>, %arg4: memref<16x32xbf16, #tpu.memory_space<vmem>>) attributes {dimension_semantics = [#tpu.dimension_semantics<parallel>], iteration_bounds = array<i64: 1>, scalar_prefetch = 0 : i64, scratch_operands = 0 : i64, tpu.core_type = #tpu.core_type<tc>, window_params = [{transform_indices = @transform_0, window_bounds = array<i64: 16, 32>}, {pipeline_mode = #tpu.pipeline_mode<synchronous>, transform_indices = @transform_1, window_bounds = array<i64: 1, 32>}, {pipeline_mode = #tpu.pipeline_mode<synchronous>, transform_indices = @transform_2, window_bounds = array<i64: 1, 32>}, {transform_indices = @transform_3, window_bounds = array<i64: 16, 32>}]} {
    %c0 = arith.constant 0 : index
    %c0_0 = arith.constant 0 : index
    %0 = vector.load %arg1[%c0, %c0_0] : memref<16x32xf32, #tpu.memory_space<vmem>>, vector<16x32xf32>
    %cst = arith.constant dense<0.000000e+00> : vector<16xf32>
    %1 = vector.multi_reduction <add>, %0, %cst [1] : vector<16x32xf32> to vector<16xf32>
    %2 = vector.shape_cast %1 : vector<16xf32> to vector<16x1xf32>
    %cst_1 = arith.constant 3.200000e+01 : f32
    %3 = vector.broadcast %cst_1 : f32 to vector<16x1xf32>
    %4 = arith.divf %2, %3 : vector<16x1xf32>
    %5 = vector.broadcast %4 : vector<16x1xf32> to vector<16x32xf32>
    %6 = arith.subf %0, %5 : vector<16x32xf32>
    %7 = arith.mulf %6, %6 : vector<16x32xf32>
    %cst_2 = arith.constant dense<0.000000e+00> : vector<16xf32>
    %8 = vector.multi_reduction <add>, %7, %cst_2 [1] : vector<16x32xf32> to vector<16xf32>
    %9 = vector.shape_cast %8 : vector<16xf32> to vector<16x1xf32>
    %cst_3 = arith.constant 3.200000e+01 : f32
    %10 = vector.broadcast %cst_3 : f32 to vector<16x1xf32>
    %11 = arith.divf %9, %10 : vector<16x1xf32>
    %12 = vector.broadcast %4 : vector<16x1xf32> to vector<16x32xf32>
    %13 = arith.subf %0, %12 : vector<16x32xf32>
    %cst_4 = arith.constant 9.99999996E-13 : f32
    %14 = vector.broadcast %cst_4 : f32 to vector<16x1xf32>
    %15 = arith.addf %11, %14 : vector<16x1xf32>
    %16 = math.rsqrt %15 : vector<16x1xf32>
    %17 = vector.broadcast %16 : vector<16x1xf32> to vector<16x32xf32>
    %18 = arith.mulf %13, %17 : vector<16x32xf32>
    %c0_5 = arith.constant 0 : index
    %c0_6 = arith.constant 0 : index
    %19 = vector.load %arg2[%c0_5, %c0_6] : memref<1x32xf32, #tpu.memory_space<vmem>>, vector<1x32xf32>
    %20 = vector.broadcast %19 : vector<1x32xf32> to vector<16x32xf32>
    %21 = arith.mulf %18, %20 : vector<16x32xf32>
    %c0_7 = arith.constant 0 : index
    %c0_8 = arith.constant 0 : index
    %22 = vector.load %arg3[%c0_7, %c0_8] : memref<1x32xf32, #tpu.memory_space<vmem>>, vector<1x32xf32>
    %23 = vector.broadcast %22 : vector<1x32xf32> to vector<16x32xf32>
    %24 = arith.addf %21, %23 : vector<16x32xf32>
    %25 = arith.truncf %24 : vector<16x32xf32> to vector<16x32xbf16>
    %c0_9 = arith.constant 0 : index
    %c0_10 = arith.constant 0 : index
    %26 = vector.load %arg4[%c0_9, %c0_10] : memref<16x32xbf16, #tpu.memory_space<vmem>>, vector<16x32xbf16>
    tpu.vector_store %arg4[%c0_9, %c0_10], %25 {strides = array<i32>} : memref<16x32xbf16, #tpu.memory_space<vmem>>, vector<16x32xbf16>,
    return
  }
  func.func @transform_0(%arg0: i32) -> (i32, i32) {
    %c0_i32 = arith.constant 0 : i32
    %c0_i32_0 = arith.constant 0 : i32
    return %arg0, %c0_i32 : i32, i32
  }
  func.func @transform_1(%arg0: i32) -> (i32, i32) {
    %c0_i32 = arith.constant 0 : i32
    %c0_i32_0 = arith.constant 0 : i32
    %c0_i32_1 = arith.constant 0 : i32
    return %c0_i32, %c0_i32_0 : i32, i32
  }
  func.func @transform_2(%arg0: i32) -> (i32, i32) {
    %c0_i32 = arith.constant 0 : i32
    %c0_i32_0 = arith.constant 0 : i32
    %c0_i32_1 = arith.constant 0 : i32
    return %c0_i32, %c0_i32_0 : i32, i32
  }
  func.func @transform_3(%arg0: i32) -> (i32, i32) {
    %c0_i32 = arith.constant 0 : i32
    %c0_i32_0 = arith.constant 0 : i32
    return %arg0, %c0_i32 : i32, i32
  }
}

</mosaic_0001>

<bundles_post_ra>
// kernel: tpu_custom_call.1
= control target key start
LH: loop header
LB: loop body
LE: loop exit
PB: predicated region body
PF: predicated region fallthrough
CT: control target
= control target key end

     0   :  { %8 = vsyncpa [#allocation3], 0  ;;  %s207_s0 = inlined_call_operand.hbm [shape: f32[16,32], index: 0, kind: input, shape index: {}]   ;;  %s208_s1 = inlined_call_operand.vmem [shape: f32[1,32], index: 1, kind: input, shape index: {}]   ;;  %s209_s2 = inlined_call_operand.vmem [shape: f32[1,32], index: 2, kind: input, shape index: {}]   ;;  %s210_s3 = inlined_call_operand.hbm [shape: bf16[16,32], index: 3, kind: output, shape index: {}]  }
   0x1   :  { %9 = vsyncpa [#allocation4], 0  ;;  %s165_s12 = smov [#allocation2]  }
   0x2   :  { %s15_s13 = sshll.u32 %s165_s12, 4  ;;  %s16_s13 = int_to_ptr.vmem [resolvable:$true] %s15_s13 }
   0x3   :  { %s129_s14 = scalar_lea.vmem %s16_s13, 256  ;;  %p134_p1 = scmp.lt.s32.totalorder %s16_s13, %s16_s13 }
   0x4   :  { %p130_p0 = scmp.ne.s32.totalorder %s16_s13, %s129_s14  ;;  %p135_p2 = scmp.lt.s32.totalorder %s129_s14, %s129_s14 }
   0x6   :  { %p136_p3 = por %p135_p2, %p134_p1 }
   0x8   :  { %p137_p4 = pnand %p136_p3, %p130_p0 }
   0xa   :  { %140 = shalt.err (!%p137_p4)
}
   0xb   :  { %s166_s15 = smov 128   ;;  %s167_s16 = smov 8  }
   0xc   :  { %21 = dma.hbm_to_vmem [thread:$0]  %s207_s0, 256, %s16_s13, [#allocation3], %s166_s15, %s166_s15, %s167_s16  }
   0xd   :  { %161 = dma.done.wait [#allocation3], 256  }
   0xe   :  { %162 = vsyncadd [#allocation3], 4294967040  ;;  %vm31_vm0 = vcmask 261120   ;;  %v29_v0 = vld [vmem:[#allocation2] sm:$0xff]  ;;  %v30_v1 = vld [vmem:[#allocation2 + $0x8] sm:$0xff]  ;;  %vm85_vm1 = vcmask 257024  }
   0xf   :  { %v32_v2 = vsel %vm31_vm0, %v29_v0, 0.0  ;;  %v35_v3 = vsel %vm31_vm0, %v30_v1, 0.0  ;;  %v105_v21 = vld [vmem:[%s208_s1] ss:$0 sm:$0xff]  ;;  %s168_s22 = smov [#allocation5]  }
  0x10   :  { %33 = vadd.xlane.f32.xlu0 %v32_v2  ;;  %v106_v23 = vld [vmem:[%s209_s2] ss:$0 sm:$0xff]  ;;  %s93_s23 = sshll.u32 %s168_s22, 4  ;;  %s94_s23 = int_to_ptr.vmem [resolvable:$true] %s93_s23 }
  0x11   :  { %s141_s1 = scalar_lea.vmem %s94_s23, 128  ;;  %p146_p6 = scmp.lt.s32.totalorder %s94_s23, %s94_s23 }
  0x12   :  { %p142_p5 = scmp.ne.s32.totalorder %s94_s23, %s141_s1  ;;  %p147_p7 = scmp.lt.s32.totalorder %s141_s1, %s141_s1 }
  0x14   :  { %36 = vadd.xlane.f32.xlu0 %v35_v3  ;;  %p148_p8 = por %p147_p7, %p146_p6 }
  0x16   :  { %p149_p9 = pnand %p148_p8, %p142_p5 }
  0x99   :  { %v34_v4 = vpop.xlane.xlu0 %33 }
  0x9a   :  { %v39_v5 = vmul.f32 0.03125, %v34_v4 }
  0x9c   :  { %v41_v6 = vsub.f32 %v29_v0, %v39_v5 }
  0x9d   :  { %v37_v7 = vpop.xlane.xlu0 %36 }
  0x9e   :  { %v40_v8 = vmul.f32 0.03125, %v37_v7  ;;  %v43_v9 = vmul.f32 %v41_v6, %v41_v6 }
  0xa0   :  { %v42_v10 = vsub.f32 %v30_v1, %v40_v8  ;;  %v45_v11 = vsel %vm31_vm0, %v43_v9, 0.0 }
  0xa1   :  { %46 = vadd.xlane.f32.xlu1 %v45_v11 }
  0xa2   :  { %v44_v12 = vmul.f32 %v42_v10, %v42_v10 }
  0xa4   :  { %v48_v13 = vsel %vm31_vm0, %v44_v12, 0.0 }
  0xa5   :  { %49 = vadd.xlane.f32.xlu1 %v48_v13 }
 0x12a   :  { %v47_v14 = vpop.xlane.xlu1 %46 }
 0x12b   :  { %v51_v15 = vmul.f32 0.03125, %v47_v14 }
 0x12d   :  { %v53_v16 = vadd.f32 1e-12, %v51_v15 }
 0x12e   :  { %v50_v17 = vpop.xlane.xlu1 %49 }
 0x12f   :  { %117 = vrsqrt.f32 %v53_v16  ;;  %v52_v18 = vmul.f32 0.03125, %v50_v17 }
 0x131   :  { %v54_v19 = vadd.f32 1e-12, %v52_v18 }
 0x133   :  { %119 = vrsqrt.f32 %v54_v19 }
 0x13c   :  { %v118_v20 = vpop.eup %117 }
 0x13d   :  { %v57_v22 = vmul.f32 %v118_v20, %v41_v6 }
 0x13f   :  { %v66_v24 = vmul.f32 %v105_v21, %v57_v22 }
 0x140   :  { %v120_v25 = vpop.eup %119 }
 0x141   :  { %v58_v26 = vmul.f32 %v120_v25, %v42_v10  ;;  %v75_v27 = vadd.f32 %v106_v23, %v66_v24 }
 0x143   :  { %v67_v28 = vmul.f32 %v105_v21, %v58_v26  ;;  %v109_v29 = vpack.c.bf16 %v75_v27, %v75_v27 }
 0x145   :  { %v76_v30 = vadd.f32 %v106_v23, %v67_v28  ;;  %86 = vst.msk [vmem:[#allocation5] sm:$0xf] %vm85_vm1, %v109_v29 }
 0x147   :  { %v110_v31 = vpack.c.bf16 %v76_v30, %v76_v30 }
 0x149   :  { %87 = vst.msk [vmem:[#allocation5 + $0x4] sm:$0xf] %vm85_vm1, %v110_v31 }
 0x14a   :  { %152 = shalt.err (!%p149_p9)
}
 0x14b   :  { %s169_s2 = smov 64   ;;  %s170_s24 = smov 4  }
 0x14c   :  { %99 = dma.vmem_to_hbm [thread:$0]  %s94_s23, 128, %s210_s3, [#allocation4], %s169_s2, %s169_s2, %s170_s24  }
 0x14d   :  { %163 = dma.done.wait [#allocation4], 128  }
 0x14e   :  { %164 = vsyncadd [#allocation4], 4294967168 }
 0x14f   :  { %103 = vsyncpa [#allocation3], 1 }
 0x150   :  { %104 = vsyncpa [#allocation4], 1 }

</bundles_post_ra>
